<compile_context>
chip_gen: v7x
topology: tpu7x:2x2x1
jax: 0.10.0
libtpu: 0.0.40
codegen_flags: <defaults>
</compile_context>

<pallas_src>
import jax
import jax.numpy as jnp
from jax.experimental import pallas as pl
from jax.experimental.pallas import tpu as pltpu


def _gelu_tanh_kernel(x_ref, o_ref):
    # tanh-approximate GELU:
    #   0.5 * x * (1 + tanh( sqrt(2/pi) * (x + 0.044715 * x^3) ))
    x = x_ref[...].astype(jnp.float32)
    c = jnp.float32(0.7978845608028654)  # sqrt(2/pi)
    inner = c * (x + jnp.float32(0.044715) * x * x * x)
    y = jnp.float32(0.5) * x * (jnp.float32(1.0) + jnp.tanh(inner))
    o_ref[...] = y.astype(o_ref.dtype)


_TARGET_BLOCK_BYTES = 8 * 1024 * 1024     # ~8 MiB per input block
_MIN_SPLIT_BLOCK_BYTES = 2 * 1024 * 1024  # don't split if halves would be < 2 MiB
_RAGGED_CHUNK_BYTES = 1 * 1024 * 1024     # conservative chunk for (1, n) ragged view


def _sublane_multiple(dtype) -> int:
    nbytes = jnp.dtype(dtype).itemsize
    if nbytes >= 4:
        return 8
    if nbytes == 2:
        return 16
    return 32


def _vmem_limit_bytes() -> int:
    """Generation-aware scoped-VMEM budget (best effort, safe fallback)."""
    try:
        cap = int(pltpu.get_tpu_info().vmem_capacity_bytes)
    except Exception:
        cap = 64 * 1024 * 1024
    if cap >= 128 * 1024 * 1024:
        return 96 * 1024 * 1024   # v5e / v6e: 128 MiB physical
    return 48 * 1024 * 1024       # v7x: 64 MiB physical, leave scratch headroom


def _cost_estimate(n_elems: int, itemsize: int) -> pl.CostEstimate:
    return pl.CostEstimate(
        flops=10 * n_elems,
        transcendentals=n_elems,
        bytes_accessed=2 * n_elems * itemsize,
    )


def _compiler_params() -> pltpu.CompilerParams:
    return pltpu.CompilerParams(
        dimension_semantics=("parallel",),
        vmem_limit_bytes=_vmem_limit_bytes(),
    )


def gelu_tanh_pallas(x: jax.Array) -> jax.Array:
    """Elementwise tanh-GELU via a Pallas TPU kernel (floating dtypes only)."""
    if not jnp.issubdtype(x.dtype, jnp.floating):
        raise TypeError(f"gelu_tanh_pallas expects a floating dtype, got {x.dtype}")

    orig_shape = x.shape
    dtype = x.dtype
    n = x.size
    if n == 0:
        return x

    itemsize = jnp.dtype(dtype).itemsize
    sub = _sublane_multiple(dtype)
    x_flat = jnp.ravel(x)

    # Pick the widest lane-dense width that divides n exactly.
    width = next((w for w in (1024, 512, 256, 128) if n % w == 0), None)

    if width is not None:
        rows = n // width
        x2d = x_flat.reshape(rows, width)
        row_bytes = width * itemsize

        rows_per_block = max(sub, (_TARGET_BLOCK_BYTES // row_bytes) // sub * sub)
        min_split_rows = max(sub, (_MIN_SPLIT_BLOCK_BYTES // row_bytes) // sub * sub)

        if rows <= rows_per_block:
            if rows >= 2 * min_split_rows:
                # Fits in one ~8 MiB block but is big enough that an even 2-way
                # split keeps both v7x TensorCores busy with >= 2 MiB blocks.
                tr = pl.cdiv(pl.cdiv(rows, 2), sub) * sub
            else:
                # Small/medium input: single full-extent block (best on 1-TC parts).
                tr = rows
        else:
            # Multiple ~8 MiB blocks; round the block count up to even so the
            # parallel grid axis splits evenly across v7x's 2 TensorCores.
            nb = pl.cdiv(rows, rows_per_block)
            if nb % 2 == 1:
                nb += 1
            tr = pl.cdiv(pl.cdiv(rows, nb), sub) * sub
        tr = min(tr, rows)

        out2d = pl.pallas_call(
            _gelu_tanh_kernel,
            out_shape=jax.ShapeDtypeStruct((rows, width), dtype),
            grid_spec=pltpu.PrefetchScalarGridSpec(
                num_scalar_prefetch=0,
                grid=(pl.cdiv(rows, tr),),
                in_specs=[pl.BlockSpec((tr, width), lambda i: (i, 0))],
                out_specs=pl.BlockSpec((tr, width), lambda i: (i, 0)),
            ),
            compiler_params=_compiler_params(),
            cost_estimate=_cost_estimate(n, itemsize),
        )(x2d)
        return out2d.reshape(orig_shape)

    # Ragged flat length (not a multiple of 128): no padding pass.  View the
    # data as (1, n) and tile the lane axis in multiple-of-128 chunks; Pallas
    # masks the ragged last block (OOB tail reads are discarded by masked stores).
    x2d = x_flat.reshape(1, n)
    chunk_elems = max(128, (_RAGGED_CHUNK_BYTES // itemsize) // 128 * 128)
    chunk = n if n <= chunk_elems else chunk_elems

    out2d = pl.pallas_call(
        _gelu_tanh_kernel,
        out_shape=jax.ShapeDtypeStruct((1, n), dtype),
        grid_spec=pltpu.PrefetchScalarGridSpec(
            num_scalar_prefetch=0,
            grid=(pl.cdiv(n, chunk),),
            in_specs=[pl.BlockSpec((1, chunk), lambda i: (0, i))],
            out_specs=pl.BlockSpec((1, chunk), lambda i: (0, i)),
        ),
        compiler_params=_compiler_params(),
        cost_estimate=_cost_estimate(n, itemsize),
    )(x2d)
    return out2d.reshape(orig_shape)


def as_module_forward(x: jax.Array) -> jax.Array:
    """AsModule(f).forward(x) with f = tanh-approximate GELU."""
    return gelu_tanh_pallas(x)


if __name__ == "__main__":
    key = jax.random.PRNGKey(0)
    k0, k1 = jax.random.split(key)

    # Small NCHW input consistent with the test-file usage (divisible path).
    x = jax.random.normal(k0, (2, 4, 16, 16), dtype=jnp.float32)
    out = jax.block_until_ready(as_module_forward(x))
    ref = jax.nn.gelu(x, approximate=True)
    assert out.shape == x.shape and out.dtype == x.dtype
    assert jnp.max(jnp.abs(out - ref)) < 1e-5, "mismatch vs reference GELU"

    # Also exercise the ragged (non multiple-of-128) path, no padding pass.
    xr = jax.random.normal(k1, (5, 7, 9), dtype=jnp.float32)
    outr = jax.block_until_ready(as_module_forward(xr))
    refr = jax.nn.gelu(xr, approximate=True)
    assert outr.shape == xr.shape and outr.dtype == xr.dtype
    assert jnp.max(jnp.abs(outr - refr)) < 1e-5, "mismatch vs reference GELU (ragged)"

    print("KERNEL_OK")
</pallas_src>

<mosaic_0001>
module attributes {stable_mosaic.version = 11 : i64} {
  func.func @_gelu_tanh_kernel(%arg0: i32, %arg1: memref<2x1024xf32, #tpu.memory_space<vmem>>, %arg2: memref<2x1024xf32, #tpu.memory_space<vmem>>) attributes {dimension_semantics = [#tpu.dimension_semantics<parallel>], iteration_bounds = array<i64: 1>, scalar_prefetch = 0 : i64, scratch_operands = 0 : i64, tpu.core_type = #tpu.core_type<tc>, window_params = [{transform_indices = @transform_0, window_bounds = array<i64: 2, 1024>}, {transform_indices = @transform_1, window_bounds = array<i64: 2, 1024>}]} {
    %c0 = arith.constant 0 : index
    %c0_0 = arith.constant 0 : index
    %0 = vector.load %arg1[%c0, %c0_0] : memref<2x1024xf32, #tpu.memory_space<vmem>>, vector<2x1024xf32>
    %cst = arith.constant 4.471500e-02 : f32
    %1 = vector.broadcast %cst : f32 to vector<2x1024xf32>
    %2 = arith.mulf %1, %0 : vector<2x1024xf32>
    %3 = arith.mulf %2, %0 : vector<2x1024xf32>
    %4 = arith.mulf %3, %0 : vector<2x1024xf32>
    %5 = arith.addf %0, %4 : vector<2x1024xf32>
    %cst_1 = arith.constant 0.797884583 : f32
    %6 = vector.broadcast %cst_1 : f32 to vector<2x1024xf32>
    %7 = arith.mulf %6, %5 : vector<2x1024xf32>
    %cst_2 = arith.constant 5.000000e-01 : f32
    %8 = vector.broadcast %cst_2 : f32 to vector<2x1024xf32>
    %9 = arith.mulf %8, %0 : vector<2x1024xf32>
    %10 = math.tanh %7 : vector<2x1024xf32>
    %cst_3 = arith.constant 1.000000e+00 : f32
    %11 = vector.broadcast %cst_3 : f32 to vector<2x1024xf32>
    %12 = arith.addf %11, %10 : vector<2x1024xf32>
    %13 = arith.mulf %9, %12 : vector<2x1024xf32>
    %c0_4 = arith.constant 0 : index
    %c0_5 = arith.constant 0 : index
    %14 = vector.load %arg2[%c0_4, %c0_5] : memref<2x1024xf32, #tpu.memory_space<vmem>>, vector<2x1024xf32>
    tpu.vector_store %arg2[%c0_4, %c0_5], %13 {strides = array<i32>} : memref<2x1024xf32, #tpu.memory_space<vmem>>, vector<2x1024xf32>,
    return
  }
  func.func @transform_0(%arg0: i32) -> (i32, i32) {
    %c0_i32 = arith.constant 0 : i32
    %c0_i32_0 = arith.constant 0 : i32
    return %arg0, %c0_i32 : i32, i32
  }
  func.func @transform_1(%arg0: i32) -> (i32, i32) {
    %c0_i32 = arith.constant 0 : i32
    %c0_i32_0 = arith.constant 0 : i32
    return %arg0, %c0_i32 : i32, i32
  }
}

</mosaic_0001>

<bundles_post_ra>
// kernel: tpu_custom_call.1
= control target key start
LH: loop header
LB: loop body
LE: loop exit
PB: predicated region body
PF: predicated region fallthrough
CT: control target
= control target key end

     0   :  { %6 = vsyncpa [#allocation3], 0  ;;  %s148_s0 = inlined_call_operand.hbm [shape: f32[2,1024], index: 0, kind: input, shape index: {}]   ;;  %s149_s1 = inlined_call_operand.hbm [shape: f32[2,1024], index: 1, kind: output, shape index: {}]  }
   0x1   :  { %7 = vsyncpa [#allocation4], 0  ;;  %s112_s6 = smov [#allocation2]   ;;  %s64_s10 = scalar_lea.hbm %s148_s0, 256 }
   0x2   :  { %s14_s7 = sshll.u32 %s112_s6, 4  ;;  %p65_p0 = scmp.ne.s32.totalorder %s148_s0, %s64_s10  ;;  %s15_s7 = int_to_ptr.vmem [resolvable:$true] %s14_s7 }
   0x3   :  { %p68_p1 = scmp.lt.u32.totalorder %s64_s10, %s148_s0 }
   0x5   :  { %p70_p2 = pnand %p68_p1, %p65_p0 }
   0x7   :  { %73 = shalt.err (!%p70_p2)
}
   0x8   :  { %s74_s15 = scalar_lea.vmem %s15_s7, 256  ;;  %p79_p4 = scmp.lt.s32.totalorder %s15_s7, %s15_s7 }
   0x9   :  { %p75_p3 = scmp.ne.s32.totalorder %s15_s7, %s74_s15  ;;  %p80_p5 = scmp.lt.s32.totalorder %s74_s15, %s74_s15 }
   0xb   :  { %p81_p6 = por %p80_p5, %p79_p4 }
   0xd   :  { %p82_p7 = pnand %p81_p6, %p75_p3 }
   0xf   :  { %85 = shalt.err (!%p82_p7)
}
  0x10   :  { %17 = dma.hbm_to_vmem [thread:$0]  %s148_s0, 256, %s15_s7, [#allocation3]  }
  0x11   :  { %108 = dma.done.wait [#allocation3], 256  }
  0x12   :  { %109 = vsyncadd [#allocation3], 4294967040  ;;  %v21_v0 = vld [vmem:[#allocation2] sm:$0xff]  ;;  %v22_v1 = vld [vmem:[#allocation2 + $0x8] sm:$0xff]  ;;  %s113_s0 = smov [#allocation5]  }
  0x13   :  { %v23_v2 = vmul.f32 0.044715, %v21_v0  ;;  %v24_v3 = vmul.f32 0.044715, %v22_v1  ;;  %v33_v12 = vmul.f32 0.5, %v21_v0  ;;  %v34_v14 = vmul.f32 0.5, %v22_v1 }
  0x14   :  { %s49_s18 = sshll.u32 %s113_s0, 4  ;;  %s50_s18 = int_to_ptr.vmem [resolvable:$true] %s49_s18 }
  0x15   :  { %v25_v4 = vmul.f32 %v23_v2, %v21_v0  ;;  %v26_v5 = vmul.f32 %v24_v3, %v22_v1  ;;  %s86_s19 = scalar_lea.vmem %s50_s18, 256  ;;  %p91_p9 = scmp.lt.s32.totalorder %s50_s18, %s50_s18 }
  0x16   :  { %p87_p8 = scmp.ne.s32.totalorder %s50_s18, %s86_s19  ;;  %p92_p10 = scmp.lt.s32.totalorder %s86_s19, %s86_s19 }
  0x17   :  { %v27_v6 = vmul.f32 %v25_v4, %v21_v0  ;;  %v28_v7 = vmul.f32 %v26_v5, %v22_v1 }
  0x18   :  { %p93_p11 = por %p92_p10, %p91_p9 }
  0x19   :  { %v29_v8 = vadd.f32 %v27_v6, %v21_v0  ;;  %v30_v9 = vadd.f32 %v28_v7, %v22_v1 }
  0x1a   :  { %p94_p12 = pnand %p93_p11, %p87_p8 }
  0x1b   :  { %v31_v10 = vmul.f32 0.7978846, %v29_v8  ;;  %v32_v11 = vmul.f32 0.7978846, %v30_v9 }
  0x1d   :  { %60 = vtanh.f32 %v31_v10 }
  0x1e   :  { %62 = vtanh.f32 %v32_v11 }
  0x27   :  { %v61_v13 = vpop.eup %60 }
  0x28   :  { %v63_v15 = vpop.eup %62  ;;  %v37_v16 = vadd.f32 1.0, %v61_v13 }
  0x29   :  { %v38_v17 = vadd.f32 1.0, %v63_v15 }
  0x2a   :  { %v39_v18 = vmul.f32 %v37_v16, %v33_v12 }
  0x2b   :  { %v40_v19 = vmul.f32 %v38_v17, %v34_v14 }
  0x2c   :  { %41 = vst [vmem:[#allocation5] sm:$0xff] %v39_v18 }
  0x2d   :  { %42 = vst [vmem:[#allocation5 + $0x8] sm:$0xff] %v40_v19 }
  0x2e   :  { %97 = shalt.err (!%p94_p12)
}
  0x2f   :  { %s98_s22 = scalar_lea.hbm %s149_s1, 256 }
  0x30   :  { %p99_p13 = scmp.ne.s32.totalorder %s149_s1, %s98_s22  ;;  %p102_p0 = scmp.lt.u32.totalorder %s98_s22, %s149_s1 }
  0x32   :  { %p104_p1 = pnand %p102_p0, %p99_p13 }
  0x34   :  { %107 = shalt.err (!%p104_p1)
}
  0x35   :  { %52 = dma.vmem_to_hbm [thread:$0]  %s50_s18, 256, %s149_s1, [#allocation4]  }
  0x36   :  { %110 = dma.done.wait [#allocation4], 256  }
  0x37   :  { %111 = vsyncadd [#allocation4], 4294967040 }
  0x38   :  { %56 = vsyncpa [#allocation3], 1 }
  0x39   :  { %57 = vsyncpa [#allocation4], 1 }

</bundles_post_ra>
